<compile_context>
chip_gen: v5e
topology: v5e:2x2
jax: 0.10.0
libtpu: 0.0.40
codegen_flags: <defaults>
</compile_context>

<pallas_src>
import functools

import numpy as np
import jax
import jax.numpy as jnp
from jax.experimental import pallas as pl
from jax.experimental.pallas import tpu as pltpu


def _round_up(x, m):
    return ((x + m - 1) // m) * m


# ----------------------------------------------------------------------------
# GBLinear kernel (row-tiled; used for the fused q/k/v and the attention bias)
# ----------------------------------------------------------------------------
def gblinear_kernel(sca_ref, vec_ref, wv1t_ref, wv2t_ref, ws1t_ref,
                    ws2at_ref, ws2bt_ref, wgt_ref, bg_ref,
                    out_sca_ref, out_vec_ref):
    f32 = jnp.float32
    tn = sca_ref.shape[0]
    in_v = vec_ref.shape[2]

    sca = sca_ref[...]                                     # (tn, in_s)
    vec_flat = vec_ref[...].reshape(3 * tn, in_v)          # (3*tn, in_v)

    # VNLinear #1: one matmul over all 3 spatial components
    v_inter = jnp.dot(vec_flat, wv1t_ref[...],
                      preferred_element_type=f32)          # (3*tn, H)
    hdim = v_inter.shape[1]
    vi = v_inter.reshape(3, tn, hdim)
    v_norm = jnp.sqrt(vi[0] * vi[0] + vi[1] * vi[1] + vi[2] * vi[2])

    z_sca = jnp.dot(sca, ws1t_ref[...], preferred_element_type=f32)
    out_sca = (jnp.dot(v_norm, ws2at_ref[...], preferred_element_type=f32)
               + jnp.dot(z_sca, ws2bt_ref[...], preferred_element_type=f32))
    gate = jax.nn.sigmoid(
        jnp.dot(out_sca, wgt_ref[...], preferred_element_type=f32)
        + bg_ref[...])                                     # (tn, out_v)

    out_v_flat = jnp.dot(v_inter, wv2t_ref[...],
                         preferred_element_type=f32)       # (3*tn, out_v)
    out_sca_ref[...] = out_sca
    out_vec_ref[...] = (out_v_flat.reshape(3, tn, out_v_flat.shape[1])
                        * gate[None, :, :])


def gblinear_pallas(p, sca, vec_cm, *, tile_rows=256):
    """sca: (N, in_s), vec_cm: (3, N, in_v) -> ((N, out_s), (3, N, out_v))."""
    n, in_s = sca.shape
    in_v = vec_cm.shape[2]
    tile_rows = max(8, (tile_rows // 8) * 8)
    tn = min(tile_rows, _round_up(n, 8))
    n_pad = _round_up(n, tn)
    if n_pad != n:
        sca = jnp.pad(sca, ((0, n_pad - n), (0, 0)))
        vec_cm = jnp.pad(vec_cm, ((0, 0), (0, n_pad - n), (0, 0)))
    grid = (n_pad // tn,)

    out_s, out_v = pl.pallas_call(
        gblinear_kernel,
        grid=grid,
        in_specs=[
            pl.BlockSpec((tn, in_s), lambda i: (i, 0)),
            pl.BlockSpec((3, tn, in_v), lambda i: (0, i, 0)),
            pl.BlockSpec(p['wv1t'].shape, lambda i: (0, 0)),
            pl.BlockSpec(p['wv2t'].shape, lambda i: (0, 0)),
            pl.BlockSpec(p['ws1t'].shape, lambda i: (0, 0)),
            pl.BlockSpec(p['ws2at'].shape, lambda i: (0, 0)),
            pl.BlockSpec(p['ws2bt'].shape, lambda i: (0, 0)),
            pl.BlockSpec(p['wgt'].shape, lambda i: (0, 0)),
            pl.BlockSpec(p['bg2d'].shape, lambda i: (0, 0)),
        ],
        out_specs=(pl.BlockSpec((tn, p['out_s']), lambda i: (i, 0)),
                   pl.BlockSpec((3, tn, p['out_v']), lambda i: (0, i, 0))),
        out_shape=(jax.ShapeDtypeStruct((n_pad, p['out_s']), jnp.float32),
                   jax.ShapeDtypeStruct((3, n_pad, p['out_v']), jnp.float32)),
        compiler_params=pltpu.CompilerParams(
            dimension_semantics=("parallel",)),
    )(sca, vec_cm, p['wv1t'], p['wv2t'], p['ws1t'], p['ws2at'], p['ws2bt'],
      p['wgt'], p['bg2d'])
    return out_s[:n], out_v[:, :n]


# ----------------------------------------------------------------------------
# Attention aggregation kernel: tiled over pairs P, online segment softmax,
# one-hot rebuilt in-kernel, scatter-sums as MXU matmuls, fused LayerNorms.
# ----------------------------------------------------------------------------
def attention_kernel(idx_ref, qs_ref, ks_ref, qv_ref, kv_ref, bs_ref, bv_ref,
                     vs_ref, vv_ref, ress_ref, resv_ref,
                     gs_ref, bsh_ref, gv_ref, bvh_ref,
                     outs_ref, outv_ref,
                     m_sc, l_sc, accs_sc, accv_sc, *, heads, eps):
    f32 = jnp.float32
    NEG = jnp.float32(-1e30)
    pid = pl.program_id(0)

    n = ress_ref.shape[0]
    tp = qs_ref.shape[0]
    key_s = qs_ref.shape[1]
    key_v = qv_ref.shape[2]
    hid_s = vs_ref.shape[1]
    hid_v = vv_ref.shape[2]
    dq_s, dq_v = key_s // heads, key_v // heads
    dv_s, dv_v = hid_s // heads, hid_v // heads
    nlog = 2 * heads

    @pl.when(pid == 0)
    def _init():
        m_sc[...] = jnp.full(m_sc.shape, NEG, f32)
        l_sc[...] = jnp.zeros(l_sc.shape, f32)
        accs_sc[...] = jnp.zeros(accs_sc.shape, f32)
        accv_sc[...] = jnp.zeros(accv_sc.shape, f32)

    # one-hot segment matrix rebuilt per P-tile from int32 ids (no HBM one-hot)
    idx = idx_ref[...]                                            # (tp, 1)
    match = jax.lax.broadcasted_iota(jnp.int32, (tp, n), 1) == idx
    oh = match.astype(f32)                                        # (tp, n)
    ohT = oh.T                                                    # (n, tp)

    # per-head q.k reductions via one matmul with a block-selector matrix
    sel_s = (jax.lax.broadcasted_iota(jnp.int32, (key_s, heads), 0) // dq_s
             == jax.lax.broadcasted_iota(jnp.int32, (key_s, heads), 1)
             ).astype(f32)
    sel_v = (jax.lax.broadcasted_iota(jnp.int32, (key_v, heads), 0) // dq_v
             == jax.lax.broadcasted_iota(jnp.int32, (key_v, heads), 1)
             ).astype(f32)
    prod_s = qs_ref[...] * ks_ref[...]                            # (tp, key_s)
    prod_v = (qv_ref[0] * kv_ref[0] + qv_ref[1] * kv_ref[1]
              + qv_ref[2] * kv_ref[2])                            # (tp, key_v)
    a_s = bs_ref[...] + jnp.dot(prod_s, sel_s, preferred_element_type=f32)
    a_v = bv_ref[...] + jnp.dot(prod_v, sel_v, preferred_element_type=f32)
    logits = jnp.concatenate([a_s, a_v], axis=1)                  # (tp, 2H)

    # ---- online segment-softmax state update (flash-style) ----
    gm_cols = [jnp.max(jnp.where(match, logits[:, c:c + 1], NEG),
                       axis=0, keepdims=True)                     # (1, n)
               for c in range(nlog)]
    pad_rows = (-nlog) % 8
    if pad_rows:
        gm_cols = gm_cols + [jnp.full((1, n), NEG, f32)] * pad_rows
    gm = jnp.concatenate(gm_cols, axis=0).T[:, :nlog]             # (n, 2H)

    m_prev = m_sc[...]
    m_new = jnp.maximum(m_prev, gm)
    alpha = jnp.exp(m_prev - m_new)                               # (n, 2H)
    m_gather = jnp.dot(oh, m_new, preferred_element_type=f32)     # (tp, 2H)
    e = jnp.exp(logits - m_gather)                                # (tp, 2H)
    l_sc[...] = alpha * l_sc[...] + jnp.dot(ohT, e,
                                            preferred_element_type=f32)
    m_sc[...] = m_new

    # broadcast per-head weights over each head's value columns via matmul
    exp_s = (jax.lax.broadcasted_iota(jnp.int32, (heads, hid_s), 1) // dv_s
             == jax.lax.broadcasted_iota(jnp.int32, (heads, hid_s), 0)
             ).astype(f32)
    exp_v = (jax.lax.broadcasted_iota(jnp.int32, (heads, hid_v), 1) // dv_v
             == jax.lax.broadcasted_iota(jnp.int32, (heads, hid_v), 0)
             ).astype(f32)
    w_s = jnp.dot(e[:, :heads], exp_s, preferred_element_type=f32)
    w_v = jnp.dot(e[:, heads:], exp_v, preferred_element_type=f32)
    alpha_s = jnp.dot(alpha[:, :heads], exp_s, preferred_element_type=f32)
    alpha_v = jnp.dot(alpha[:, heads:], exp_v, preferred_element_type=f32)
    accs_sc[...] = alpha_s * accs_sc[...] + jnp.dot(
        ohT, w_s * vs_ref[...], preferred_element_type=f32)
    for d in range(3):
        accv_sc[d] = alpha_v * accv_sc[d] + jnp.dot(
            ohT, w_v * vv_ref[d], preferred_element_type=f32)

    # ---- last P-tile: normalise, residual add, LayerNorms, store ----
    @pl.when(pid == pl.num_programs(0) - 1)
    def _finalize():
        inv = pl.reciprocal(jnp.maximum(l_sc[...], 1e-30), approx=True)
        inv_s = jnp.dot(inv[:, :heads], exp_s, preferred_element_type=f32)
        inv_v = jnp.dot(inv[:, heads:], exp_v, preferred_element_type=f32)

        x_s = ress_ref[...] + accs_sc[...] * inv_s
        mu_s = jnp.mean(x_s, axis=1, keepdims=True)
        var_s = jnp.mean((x_s - mu_s) ** 2, axis=1, keepdims=True)
        outs_ref[...] = ((x_s - mu_s) * jax.lax.rsqrt(var_s + eps)
                         * gs_ref[...] + bsh_ref[...])

        xv = [resv_ref[d] + accv_sc[d] * inv_v for d in range(3)]
        count = jnp.float32(3 * hid_v)
        mu_v = (jnp.sum(xv[0], axis=1, keepdims=True)
                + jnp.sum(xv[1], axis=1, keepdims=True)
                + jnp.sum(xv[2], axis=1, keepdims=True)) / count
        var_v = (jnp.sum((xv[0] - mu_v) ** 2, axis=1, keepdims=True)
                 + jnp.sum((xv[1] - mu_v) ** 2, axis=1, keepdims=True)
                 + jnp.sum((xv[2] - mu_v) ** 2, axis=1, keepdims=True)) / count
        inv_std = jax.lax.rsqrt(var_v + eps)
        for d in range(3):
            outv_ref[d] = (xv[d] - mu_v) * inv_std * gv_ref[d] + bvh_ref[d]


def attention_pallas(heads, idx_i, qs, ks, qv, kv, bs, bv, vs, vv,
                     ress, resv, gs, bsh, gv, bvh, *, tile_p=128):
    n, hid_s = ress.shape
    hid_v = resv.shape[2]
    key_s = qs.shape[1]
    key_v = qv.shape[2]
    p_att = qs.shape[0]

    tile_p = max(8, (tile_p // 8) * 8)
    tp = min(tile_p, _round_up(p_att, 8))
    p_pad = _round_up(p_att, tp)
    pad = p_pad - p_att
    if pad:
        qs = jnp.pad(qs, ((0, pad), (0, 0)))
        ks = jnp.pad(ks, ((0, pad), (0, 0)))
        qv = jnp.pad(qv, ((0, 0), (0, pad), (0, 0)))
        kv = jnp.pad(kv, ((0, 0), (0, pad), (0, 0)))
        bs = jnp.pad(bs, ((0, pad), (0, 0)))
        bv = jnp.pad(bv, ((0, pad), (0, 0)))
        vs = jnp.pad(vs, ((0, pad), (0, 0)))
        vv = jnp.pad(vv, ((0, 0), (0, pad), (0, 0)))
        idx_i = jnp.pad(idx_i, (0, pad), constant_values=n)  # padded -> no seg
    idx_col = idx_i.astype(jnp.int32)[:, None]               # (p_pad, 1)

    grid = (p_pad // tp,)
    kern = functools.partial(attention_kernel, heads=heads, eps=1e-5)
    return pl.pallas_call(
        kern,
        grid=grid,
        in_specs=[
            pl.BlockSpec((tp, 1), lambda i: (i, 0)),             # segment ids
            pl.BlockSpec((tp, key_s), lambda i: (i, 0)),         # q scalar
            pl.BlockSpec((tp, key_s), lambda i: (i, 0)),         # k scalar
            pl.BlockSpec((3, tp, key_v), lambda i: (0, i, 0)),   # q vector
            pl.BlockSpec((3, tp, key_v), lambda i: (0, i, 0)),   # k vector
            pl.BlockSpec((tp, heads), lambda i: (i, 0)),         # bias scalar
            pl.BlockSpec((tp, heads), lambda i: (i, 0)),         # bias vector
            pl.BlockSpec((tp, hid_s), lambda i: (i, 0)),         # v scalar
            pl.BlockSpec((3, tp, hid_v), lambda i: (0, i, 0)),   # v vector
            pl.BlockSpec((n, hid_s), lambda i: (0, 0)),          # residual sca
            pl.BlockSpec((3, n, hid_v), lambda i: (0, 0, 0)),    # residual vec
            pl.BlockSpec((1, hid_s), lambda i: (0, 0)),          # LN gamma sca
            pl.BlockSpec((1, hid_s), lambda i: (0, 0)),          # LN beta sca
            pl.BlockSpec((3, 1, hid_v), lambda i: (0, 0, 0)),    # LN gamma vec
            pl.BlockSpec((3, 1, hid_v), lambda i: (0, 0, 0)),    # LN beta vec
        ],
        out_specs=(pl.BlockSpec((n, hid_s), lambda i: (0, 0)),
                   pl.BlockSpec((3, n, hid_v), lambda i: (0, 0, 0))),
        out_shape=(jax.ShapeDtypeStruct((n, hid_s), jnp.float32),
                   jax.ShapeDtypeStruct((3, n, hid_v), jnp.float32)),
        scratch_shapes=[pltpu.VMEM((n, 2 * heads), jnp.float32),   # running max
                        pltpu.VMEM((n, 2 * heads), jnp.float32),   # running sum
                        pltpu.VMEM((n, hid_s), jnp.float32),       # acc scalar
                        pltpu.VMEM((3, n, hid_v), jnp.float32)],   # acc vector
        compiler_params=pltpu.CompilerParams(
            dimension_semantics=("arbitrary",)),
    )(idx_col, qs, ks, qv, kv, bs, bv, vs, vv, ress, resv, gs, bsh, gv, bvh)


# ----------------------------------------------------------------------------
# Parameter init (PyTorch-shaped weights + pre-transposed / fused copies)
# ----------------------------------------------------------------------------
def _init_linear(key, out_dim, in_dim):
    return (1.0 / np.sqrt(in_dim)) * jax.random.normal(
        key, (out_dim, in_dim), jnp.float32)


def init_gblinear(key, in_s, in_v, out_s, out_v):
    hid = max(in_v, out_v)        # bottleneck == 1
    sca_hid = max(in_v, out_v)
    k = jax.random.split(key, 6)
    wv1 = _init_linear(k[0], hid, in_v)
    wv2 = _init_linear(k[1], out_v, hid)
    ws1 = _init_linear(k[2], sca_hid, in_s)
    ws2 = _init_linear(k[3], out_s, hid + sca_hid)
    wg = _init_linear(k[4], out_v, out_s)
    bg = 0.1 * jax.random.normal(k[5], (out_v,), jnp.float32)
    return {
        'out_s': out_s, 'out_v': out_v, 'hid': hid,
        'wv1': wv1, 'wv2': wv2, 'ws1': ws1, 'ws2': ws2, 'wg': wg, 'bg': bg,
        'wv1t': wv1.T, 'wv2t': wv2.T, 'ws1t': ws1.T,
        'ws2at': ws2[:, :hid].T, 'ws2bt': ws2[:, hid:].T,
        'wgt': wg.T, 'bg2d': bg[None, :],
    }


def _block_diag(mats):
    rows = sum(m.shape[0] for m in mats)
    cols = sum(m.shape[1] for m in mats)
    out = jnp.zeros((rows, cols), jnp.float32)
    r = c = 0
    for m in mats:
        out = out.at[r:r + m.shape[0], c:c + m.shape[1]].set(m)
        r += m.shape[0]
        c += m.shape[1]
    return out


def fuse_gblinears(ps):
    """Fold several GBLinears sharing the same input into one set of weights."""
    return {
        'out_s': sum(p['out_s'] for p in ps),
        'out_v': sum(p['out_v'] for p in ps),
        'wv1t': jnp.concatenate([p['wv1t'] for p in ps], axis=1),
        'ws1t': jnp.concatenate([p['ws1t'] for p in ps], axis=1),
        'wv2t': _block_diag([p['wv2t'] for p in ps]),
        'ws2at': _block_diag([p['ws2at'] for p in ps]),
        'ws2bt': _block_diag([p['ws2bt'] for p in ps]),
        'wgt': _block_diag([p['wgt'] for p in ps]),
        'bg2d': jnp.concatenate([p['bg2d'] for p in ps], axis=1),
    }


def init_params(key, hidden_channels, key_channels, num_heads):
    hid_s, hid_v = hidden_channels
    key_s, key_v = key_channels
    k = jax.random.split(key, 9)
    params = {
        'q_lin': init_gblinear(k[0], hid_s, hid_v, key_s, key_v),
        'k_lin': init_gblinear(k[1], hid_s, hid_v, key_s, key_v),
        'v_lin': init_gblinear(k[2], hid_s, hid_v, hid_s, hid_v),
        'bias_lin': init_gblinear(k[3], hid_s, hid_v, num_heads, num_heads),
        'ee_w': jax.random.normal(k[4], (hid_v,), jnp.float32),   # EdgeExpansion
        'ln_sca_g': 1.0 + 0.1 * jax.random.normal(k[5], (hid_s,), jnp.float32),
        'ln_sca_b': 0.1 * jax.random.normal(k[6], (hid_s,), jnp.float32),
        'ln_vec_g': 1.0 + 0.1 * jax.random.normal(k[7], (hid_v, 3), jnp.float32),
        'ln_vec_b': 0.1 * jax.random.normal(k[8], (hid_v, 3), jnp.float32),
    }
    params['qkv_fused'] = fuse_gblinears(
        [params['q_lin'], params['k_lin'], params['v_lin']])
    return params


# ----------------------------------------------------------------------------
# AttentionEdges forward (Pallas path)
# ----------------------------------------------------------------------------
def attention_edges_pallas(params, edge_attr, edge_index, pos_compose,
                           index_real_cps_edge_for_atten, tri_edge_index,
                           tri_edge_feat, *, heads, cutoff, num_bond_types,
                           row_tile=256, pair_tile=128):
    del edge_index  # unused in the reference forward
    sca, vec = edge_attr                       # (N, hid_s), (N, hid_v, 3)
    n, hid_s = sca.shape
    vec_cm = jnp.transpose(vec, (2, 0, 1))     # kernel layout: (3, N, hid_v)

    key_s = params['q_lin']['out_s']
    key_v = params['q_lin']['out_v']

    # fused q/k/v GBLinear: one pass over the activations, wide outputs
    qkv_s, qkv_v = gblinear_pallas(params['qkv_fused'], sca, vec_cm,
                                   tile_rows=row_tile)
    q_s, k_s, v_s = (qkv_s[:, :key_s], qkv_s[:, key_s:2 * key_s],
                     qkv_s[:, 2 * key_s:])
    q_v, k_v, v_v = (qkv_v[:, :, :key_v], qkv_v[:, :, key_v:2 * key_v],
                     qkv_v[:, :, 2 * key_v:])

    idx_i, idx_j = index_real_cps_edge_for_atten

    # ----- AttentionBias features (glue: gather + elementwise smearing) -----
    na, nb = tri_edge_index
    dvec = pos_compose[na] - pos_compose[nb]                     # (P, 3)
    dist = jnp.sqrt(jnp.sum(dvec ** 2, axis=-1))
    num_g = hid_s - (num_bond_types + 1) - 1
    offset = jnp.linspace(0.0, cutoff, num_g)
    coeff = -0.5 / (offset[1] - offset[0]) ** 2
    dist_feat = jnp.exp(coeff * (dist[:, None] - offset[None, :]) ** 2)
    sca_feat = jnp.concatenate([dist_feat, tri_edge_feat], axis=-1)
    vnormed = dvec / (jnp.sqrt(jnp.sum(dvec ** 2, axis=-1, keepdims=True)) + 1e-7)
    vec_feat_cm = (jnp.transpose(vnormed)[:, :, None]
                   * params['ee_w'][None, None, :])              # (3, P, hid_v)
    b_s, b_v_cm = gblinear_pallas(params['bias_lin'], sca_feat, vec_feat_cm,
                                  tile_rows=row_tile)
    b_v = jnp.sum(b_v_cm ** 2, axis=0)                           # (P, heads)

    # ----- gathers for attention (glue) -----
    qs_i = q_s[idx_i]
    ks_j = k_s[idx_j]
    qv_i = q_v[:, idx_i, :]
    kv_j = k_v[:, idx_j, :]
    vs_j = v_s[idx_j]
    vv_j = v_v[:, idx_j, :]

    gs = params['ln_sca_g'][None, :]
    bsh = params['ln_sca_b'][None, :]
    gv = jnp.transpose(params['ln_vec_g'])[:, None, :]           # (3, 1, hid_v)
    bvh = jnp.transpose(params['ln_vec_b'])[:, None, :]

    out_s, out_v_cm = attention_pallas(heads, idx_i, qs_i, ks_j, qv_i, kv_j,
                                       b_s, b_v, vs_j, vv_j,
                                       sca, vec_cm, gs, bsh, gv, bvh,
                                       tile_p=pair_tile)
    return out_s, jnp.transpose(out_v_cm, (1, 2, 0))


# ----------------------------------------------------------------------------
# Pure-JAX reference (PyTorch layout) for validation
# ----------------------------------------------------------------------------
def gblinear_ref(p, sca, vec):
    v_inter = jnp.einsum('hc,ncd->nhd', p['wv1'], vec)
    v_norm = jnp.sqrt(jnp.sum(v_inter ** 2, axis=-1))
    z = sca @ p['ws1'].T
    out_s = jnp.concatenate([v_norm, z], axis=-1) @ p['ws2'].T
    gate = jax.nn.sigmoid(out_s @ p['wg'].T + p['bg'])
    out_v = jnp.einsum('oh,nhd->nod', p['wv2'], v_inter) * gate[:, :, None]
    return out_s, out_v


def attention_edges_ref(params, edge_attr, edge_index, pos_compose,
                        index_real_cps_edge_for_atten, tri_edge_index,
                        tri_edge_feat, *, heads, cutoff, num_bond_types):
    del edge_index
    sca, vec = edge_attr
    n, hid_s = sca.shape
    q_s, q_v = gblinear_ref(params['q_lin'], sca, vec)
    k_s, k_v = gblinear_ref(params['k_lin'], sca, vec)
    v_s, v_v = gblinear_ref(params['v_lin'], sca, vec)
    idx_i, idx_j = index_real_cps_edge_for_atten
    p_att = idx_i.shape[0]

    na, nb = tri_edge_index
    dvec = pos_compose[na] - pos_compose[nb]
    dist = jnp.sqrt(jnp.sum(dvec ** 2, axis=-1))
    num_g = hid_s - (num_bond_types + 1) - 1
    offset = jnp.linspace(0.0, cutoff, num_g)
    coeff = -0.5 / (offset[1] - offset[0]) ** 2
    dist_feat = jnp.exp(coeff * (dist[:, None] - offset[None, :]) ** 2)
    sca_feat = jnp.concatenate([dist_feat, tri_edge_feat], axis=-1)
    vnormed = dvec / (jnp.sqrt(jnp.sum(dvec ** 2, axis=-1, keepdims=True)) + 1e-7)
    vec_feat = vnormed[:, None, :] * params['ee_w'][None, :, None]
    b_s, b_v_full = gblinear_ref(params['bias_lin'], sca_feat, vec_feat)
    b_v = jnp.sum(b_v_full ** 2, axis=-1)

    qh_s = q_s.reshape(n, heads, -1)
    kh_s = k_s.reshape(n, heads, -1)
    qh_v = q_v.reshape(n, heads, -1, 3)
    kh_v = k_v.reshape(n, heads, -1, 3)
    vh_s = v_s.reshape(n, heads, -1)
    vh_v = v_v.reshape(n, heads, -1, 3)
    qk_s = jnp.sum(qh_s[idx_i] * kh_s[idx_j], axis=-1)
    qk_v = jnp.sum(qh_v[idx_i] * kh_v[idx_j], axis=(-1, -2))
    a_s = b_s + qk_s
    a_v = b_v + qk_v

    def seg_softmax(a):
        m = jax.ops.segment_max(a, idx_i, num_segments=n)
        e = jnp.exp(a - m[idx_i])
        s = jax.ops.segment_sum(e, idx_i, num_segments=n)
        return e / s[idx_i]

    w_s = seg_softmax(a_s)
    w_v = seg_softmax(a_v)
    out_s = jax.ops.segment_sum(
        (w_s[..., None] * vh_s[idx_j]).reshape(p_att, -1), idx_i, num_segments=n)
    out_v = jax.ops.segment_sum(
        (w_v[..., None, None] * vh_v[idx_j]).reshape(p_att, -1, 3),
        idx_i, num_segments=n)
    x_s = sca + out_s
    x_v = vec + out_v
    eps = 1e-5
    mu = jnp.mean(x_s, axis=-1, keepdims=True)
    var = jnp.mean((x_s - mu) ** 2, axis=-1, keepdims=True)
    y_s = (x_s - mu) / jnp.sqrt(var + eps) * params['ln_sca_g'] + params['ln_sca_b']
    mu_v = jnp.mean(x_v, axis=(-1, -2), keepdims=True)
    var_v = jnp.mean((x_v - mu_v) ** 2, axis=(-1, -2), keepdims=True)
    y_v = ((x_v - mu_v) / jnp.sqrt(var_v + eps) * params['ln_vec_g']
           + params['ln_vec_b'])
    return y_s, y_v


# ----------------------------------------------------------------------------
if __name__ == "__main__":
    # Module hyper-params (small)
    hidden_channels = (32, 8)
    key_channels = (16, 8)
    num_heads = 2
    num_bond_types = 3
    cutoff = 10.0

    N = 24           # number of edges (rows of edge_attr)
    P = 37           # number of attention pairs / tri-edges (exercises padding)
    NUM_NODES = 16   # number of composed nodes (pos_compose rows)

    root = jax.random.PRNGKey(0)
    kp, kd = jax.random.split(root)
    params = init_params(kp, hidden_channels, key_channels, num_heads)

    ks = jax.random.split(kd, 10)
    sca = jax.random.normal(ks[0], (N, hidden_channels[0]), jnp.float32)
    vec = jax.random.normal(ks[1], (N, hidden_channels[1], 3), jnp.float32)
    pos_compose = 3.0 * jax.random.normal(ks[2], (NUM_NODES, 3), jnp.float32)
    idx_i = jax.random.randint(ks[3], (P,), 0, N)
    idx_j = jax.random.randint(ks[4], (P,), 0, N)
    tri_a = jax.random.randint(ks[5], (P,), 0, NUM_NODES)
    tri_b = jax.random.randint(ks[6], (P,), 0, NUM_NODES)
    tri_edge_feat = jax.nn.one_hot(
        jax.random.randint(ks[7], (P,), 0, 5), 5, dtype=jnp.float32)
    edge_index = jnp.stack([jax.random.randint(ks[8], (N,), 0, NUM_NODES),
                            jax.random.randint(ks[9], (N,), 0, NUM_NODES)])

    edge_attr = (sca, vec)
    index_real = (idx_i, idx_j)
    tri_edge_index = (tri_a, tri_b)

    # small tiles so the row grid (3 steps) and pair grid (5 steps) are exercised
    out_s, out_v = attention_edges_pallas(
        params, edge_attr, edge_index, pos_compose, index_real,
        tri_edge_index, tri_edge_feat,
        heads=num_heads, cutoff=cutoff, num_bond_types=num_bond_types,
        row_tile=8, pair_tile=8)
    jax.block_until_ready((out_s, out_v))

    ref_s, ref_v = attention_edges_ref(
        params, edge_attr, edge_index, pos_compose, index_real,
        tri_edge_index, tri_edge_feat,
        heads=num_heads, cutoff=cutoff, num_bond_types=num_bond_types)

    np.testing.assert_allclose(np.asarray(out_s), np.asarray(ref_s),
                               rtol=5e-3, atol=5e-3)
    np.testing.assert_allclose(np.asarray(out_v), np.asarray(ref_v),
                               rtol=5e-3, atol=5e-3)
    print("KERNEL_OK")
</pallas_src>

<mosaic_0001>
module attributes {stable_mosaic.version = 11 : i64} {
  func.func @gblinear_kernel(%arg0: i32, %arg1: memref<8x32xf32, #tpu.memory_space<vmem>>, %arg2: memref<3x8x8xf32, #tpu.memory_space<vmem>>, %arg3: memref<8x24xf32, #tpu.memory_space<vmem>>, %arg4: memref<24x24xf32, #tpu.memory_space<vmem>>, %arg5: memref<32x24xf32, #tpu.memory_space<vmem>>, %arg6: memref<24x64xf32, #tpu.memory_space<vmem>>, %arg7: memref<24x64xf32, #tpu.memory_space<vmem>>, %arg8: memref<64x24xf32, #tpu.memory_space<vmem>>, %arg9: memref<1x24xf32, #tpu.memory_space<vmem>>, %arg10: memref<8x64xf32, #tpu.memory_space<vmem>>, %arg11: memref<3x8x24xf32, #tpu.memory_space<vmem>>) attributes {dimension_semantics = [#tpu.dimension_semantics<parallel>], iteration_bounds = array<i64: 3>, scalar_prefetch = 0 : i64, scratch_operands = 0 : i64, tpu.core_type = #tpu.core_type<tc>, window_params = [{transform_indices = @transform_0, window_bounds = array<i64: 8, 32>}, {transform_indices = @transform_1, window_bounds = array<i64: 3, 8, 8>}, {pipeline_mode = #tpu.pipeline_mode<synchronous>, transform_indices = @transform_2, window_bounds = array<i64: 8, 24>}, {pipeline_mode = #tpu.pipeline_mode<synchronous>, transform_indices = @transform_3, window_bounds = array<i64: 24, 24>}, {pipeline_mode = #tpu.pipeline_mode<synchronous>, transform_indices = @transform_4, window_bounds = array<i64: 32, 24>}, {pipeline_mode = #tpu.pipeline_mode<synchronous>, transform_indices = @transform_5, window_bounds = array<i64: 24, 64>}, {pipeline_mode = #tpu.pipeline_mode<synchronous>, transform_indices = @transform_6, window_bounds = array<i64: 24, 64>}, {pipeline_mode = #tpu.pipeline_mode<synchronous>, transform_indices = @transform_7, window_bounds = array<i64: 64, 24>}, {pipeline_mode = #tpu.pipeline_mode<synchronous>, transform_indices = @transform_8, window_bounds = array<i64: 1, 24>}, {transform_indices = @transform_9, window_bounds = array<i64: 8, 64>}, {transform_indices = @transform_10, window_bounds = array<i64: 3, 8, 24>}]} {
    %c0 = arith.constant 0 : index
    %c0_0 = arith.constant 0 : index
    %0 = vector.load %arg1[%c0, %c0_0] : memref<8x32xf32, #tpu.memory_space<vmem>>, vector<8x32xf32>
    %c0_1 = arith.constant 0 : index
    %c0_2 = arith.constant 0 : index
    %c0_3 = arith.constant 0 : index
    %1 = vector.load %arg2[%c0_1, %c0_2, %c0_3] : memref<3x8x8xf32, #tpu.memory_space<vmem>>, vector<3x8x8xf32>
    %2 = vector.shape_cast %1 : vector<3x8x8xf32> to vector<24x8xf32>
    %c0_4 = arith.constant 0 : index
    %c0_5 = arith.constant 0 : index
    %3 = vector.load %arg3[%c0_4, %c0_5] : memref<8x24xf32, #tpu.memory_space<vmem>>, vector<8x24xf32>
    %cst = arith.constant dense<0.000000e+00> : vector<24x24xf32>
    %4 = tpu.matmul %2, %3, %cst {dimension_numbers = #tpu.dot_dimension_numbers<[1], [0], [0], [1], [0, 0, 1, 1], [], []>} : vector<24x8xf32>, vector<8x24xf32>, vector<24x24xf32> -> vector<24x24xf32>
    %5 = vector.shape_cast %4 : vector<24x24xf32> to vector<3x8x24xf32>
    %6 = vector.extract_strided_slice %5 {offsets = [0, 0, 0], sizes = [1, 8, 24], strides = [1, 1, 1]} : vector<3x8x24xf32> to vector<1x8x24xf32>
    %7 = vector.shape_cast %6 : vector<1x8x24xf32> to vector<8x24xf32>
    %8 = vector.extract_strided_slice %5 {offsets = [0, 0, 0], sizes = [1, 8, 24], strides = [1, 1, 1]} : vector<3x8x24xf32> to vector<1x8x24xf32>
    %9 = vector.shape_cast %8 : vector<1x8x24xf32> to vector<8x24xf32>
    %10 = arith.mulf %7, %9 : vector<8x24xf32>
    %11 = vector.extract_strided_slice %5 {offsets = [1, 0, 0], sizes = [1, 8, 24], strides = [1, 1, 1]} : vector<3x8x24xf32> to vector<1x8x24xf32>
    %12 = vector.shape_cast %11 : vector<1x8x24xf32> to vector<8x24xf32>
    %13 = vector.extract_strided_slice %5 {offsets = [1, 0, 0], sizes = [1, 8, 24], strides = [1, 1, 1]} : vector<3x8x24xf32> to vector<1x8x24xf32>
    %14 = vector.shape_cast %13 : vector<1x8x24xf32> to vector<8x24xf32>
    %15 = arith.mulf %12, %14 : vector<8x24xf32>
    %16 = arith.addf %10, %15 : vector<8x24xf32>
    %17 = vector.extract_strided_slice %5 {offsets = [2, 0, 0], sizes = [1, 8, 24], strides = [1, 1, 1]} : vector<3x8x24xf32> to vector<1x8x24xf32>
    %18 = vector.shape_cast %17 : vector<1x8x24xf32> to vector<8x24xf32>
    %19 = vector.extract_strided_slice %5 {offsets = [2, 0, 0], sizes = [1, 8, 24], strides = [1, 1, 1]} : vector<3x8x24xf32> to vector<1x8x24xf32>
    %20 = vector.shape_cast %19 : vector<1x8x24xf32> to vector<8x24xf32>
    %21 = arith.mulf %18, %20 : vector<8x24xf32>
    %22 = arith.addf %16, %21 : vector<8x24xf32>
    %23 = math.sqrt %22 : vector<8x24xf32>
    %c0_6 = arith.constant 0 : index
    %c0_7 = arith.constant 0 : index
    %24 = vector.load %arg5[%c0_6, %c0_7] : memref<32x24xf32, #tpu.memory_space<vmem>>, vector<32x24xf32>
    %cst_8 = arith.constant dense<0.000000e+00> : vector<8x24xf32>
    %25 = tpu.matmul %0, %24, %cst_8 {dimension_numbers = #tpu.dot_dimension_numbers<[1], [0], [0], [1], [0, 0, 1, 1], [], []>} : vector<8x32xf32>, vector<32x24xf32>, vector<8x24xf32> -> vector<8x24xf32>
    %c0_9 = arith.constant 0 : index
    %c0_10 = arith.constant 0 : index
    %26 = vector.load %arg6[%c0_9, %c0_10] : memref<24x64xf32, #tpu.memory_space<vmem>>, vector<24x64xf32>
    %cst_11 = arith.constant dense<0.000000e+00> : vector<8x64xf32>
    %27 = tpu.matmul %23, %26, %cst_11 {dimension_numbers = #tpu.dot_dimension_numbers<[1], [0], [0], [1], [0, 0, 1, 1], [], []>} : vector<8x24xf32>, vector<24x64xf32>, vector<8x64xf32> -> vector<8x64xf32>
    %c0_12 = arith.constant 0 : index
    %c0_13 = arith.constant 0 : index
    %28 = vector.load %arg7[%c0_12, %c0_13] : memref<24x64xf32, #tpu.memory_space<vmem>>, vector<24x64xf32>
    %cst_14 = arith.constant dense<0.000000e+00> : vector<8x64xf32>
    %29 = tpu.matmul %25, %28, %cst_14 {dimension_numbers = #tpu.dot_dimension_numbers<[1], [0], [0], [1], [0, 0, 1, 1], [], []>} : vector<8x24xf32>, vector<24x64xf32>, vector<8x64xf32> -> vector<8x64xf32>
    %30 = arith.addf %27, %29 : vector<8x64xf32>
    %c0_15 = arith.constant 0 : index
    %c0_16 = arith.constant 0 : index
    %31 = vector.load %arg8[%c0_15, %c0_16] : memref<64x24xf32, #tpu.memory_space<vmem>>, vector<64x24xf32>
    %cst_17 = arith.constant dense<0.000000e+00> : vector<8x24xf32>
    %32 = tpu.matmul %30, %31, %cst_17 {dimension_numbers = #tpu.dot_dimension_numbers<[1], [0], [0], [1], [0, 0, 1, 1], [], []>} : vector<8x64xf32>, vector<64x24xf32>, vector<8x24xf32> -> vector<8x24xf32>
    %c0_18 = arith.constant 0 : index
    %c0_19 = arith.constant 0 : index
    %33 = vector.load %arg9[%c0_18, %c0_19] : memref<1x24xf32, #tpu.memory_space<vmem>>, vector<1x24xf32>
    %34 = vector.broadcast %33 : vector<1x24xf32> to vector<8x24xf32>
    %35 = arith.addf %32, %34 : vector<8x24xf32>
    %36 = arith.negf %35 : vector<8x24xf32>
    %37 = math.exp %36 : vector<8x24xf32>
    %cst_20 = arith.constant 1.000000e+00 : f32
    %38 = vector.broadcast %cst_20 : f32 to vector<8x24xf32>
    %39 = arith.addf %38, %37 : vector<8x24xf32>
    %40 = arith.divf %38, %39 : vector<8x24xf32>
    %c0_21 = arith.constant 0 : index
    %c0_22 = arith.constant 0 : index
    %41 = vector.load %arg4[%c0_21, %c0_22] : memref<24x24xf32, #tpu.memory_space<vmem>>, vector<24x24xf32>
    %cst_23 = arith.constant dense<0.000000e+00> : vector<24x24xf32>
    %42 = tpu.matmul %4, %41, %cst_23 {dimension_numbers = #tpu.dot_dimension_numbers<[1], [0], [0], [1], [0, 0, 1, 1], [], []>} : vector<24x24xf32>, vector<24x24xf32>, vector<24x24xf32> -> vector<24x24xf32>
    %c0_24 = arith.constant 0 : index
    %c0_25 = arith.constant 0 : index
    %43 = vector.load %arg10[%c0_24, %c0_25] : memref<8x64xf32, #tpu.memory_space<vmem>>, vector<8x64xf32>
    tpu.vector_store %arg10[%c0_24, %c0_25], %30 {strides = array<i32>} : memref<8x64xf32, #tpu.memory_space<vmem>>, vector<8x64xf32>,
    %44 = vector.shape_cast %42 : vector<24x24xf32> to vector<3x8x24xf32>
    %45 = vector.shape_cast %40 : vector<8x24xf32> to vector<1x8x24xf32>
    %46 = vector.broadcast %45 : vector<1x8x24xf32> to vector<3x8x24xf32>
    %47 = arith.mulf %44, %46 : vector<3x8x24xf32>
    %c0_26 = arith.constant 0 : index
    %c0_27 = arith.constant 0 : index
    %c0_28 = arith.constant 0 : index
    %48 = vector.load %arg11[%c0_26, %c0_27, %c0_28] : memref<3x8x24xf32, #tpu.memory_space<vmem>>, vector<3x8x24xf32>
    tpu.vector_store %arg11[%c0_26, %c0_27, %c0_28], %47 {strides = array<i32>} : memref<3x8x24xf32, #tpu.memory_space<vmem>>, vector<3x8x24xf32>,
    return
  }
  func.func @transform_0(%arg0: i32) -> (i32, i32) {
    %c0_i32 = arith.constant 0 : i32
    %c0_i32_0 = arith.constant 0 : i32
    return %arg0, %c0_i32 : i32, i32
  }
  func.func @transform_1(%arg0: i32) -> (i32, i32, i32) {
    %c0_i32 = arith.constant 0 : i32
    %c0_i32_0 = arith.constant 0 : i32
    %c0_i32_1 = arith.constant 0 : i32
    return %c0_i32, %arg0, %c0_i32_0 : i32, i32, i32
  }
  func.func @transform_2(%arg0: i32) -> (i32, i32) {
    %c0_i32 = arith.constant 0 : i32
    %c0_i32_0 = arith.constant 0 : i32
    %c0_i32_1 = arith.constant 0 : i32
    return %c0_i32, %c0_i32_0 : i32, i32
  }
  func.func @transform_3(%arg0: i32) -> (i32, i32) {
    %c0_i32 = arith.constant 0 : i32
    %c0_i32_0 = arith.constant 0 : i32
    %c0_i32_1 = arith.constant 0 : i32
    return %c0_i32, %c0_i32_0 : i32, i32
  }
  func.func @transform_4(%arg0: i32) -> (i32, i32) {
    %c0_i32 = arith.constant 0 : i32
    %c0_i32_0 = arith.constant 0 : i32
    %c0_i32_1 = arith.constant 0 : i32
    return %c0_i32, %c0_i32_0 : i32, i32
  }
  func.func @transform_5(%arg0: i32) -> (i32, i32) {
    %c0_i32 = arith.constant 0 : i32
    %c0_i32_0 = arith.constant 0 : i32
    %c0_i32_1 = arith.constant 0 : i32
    return %c0_i32, %c0_i32_0 : i32, i32
  }
  func.func @transform_6(%arg0: i32) -> (i32, i32) {
    %c0_i32 = arith.constant 0 : i32
    %c0_i32_0 = arith.constant 0 : i32
    %c0_i32_1 = arith.constant 0 : i32
    return %c0_i32, %c0_i32_0 : i32, i32
  }
  func.func @transform_7(%arg0: i32) -> (i32, i32) {
    %c0_i32 = arith.constant 0 : i32
    %c0_i32_0 = arith.constant 0 : i32
    %c0_i32_1 = arith.constant 0 : i32
    return %c0_i32, %c0_i32_0 : i32, i32
  }
  func.func @transform_8(%arg0: i32) -> (i32, i32) {
    %c0_i32 = arith.constant 0 : i32
    %c0_i32_0 = arith.constant 0 : i32
    %c0_i32_1 = arith.constant 0 : i32
    return %c0_i32, %c0_i32_0 : i32, i32
  }
  func.func @transform_9(%arg0: i32) -> (i32, i32) {
    %c0_i32 = arith.constant 0 : i32
    %c0_i32_0 = arith.constant 0 : i32
    return %arg0, %c0_i32 : i32, i32
  }
  func.func @transform_10(%arg0: i32) -> (i32, i32, i32) {
    %c0_i32 = arith.constant 0 : i32
    %c0_i32_0 = arith.constant 0 : i32
    %c0_i32_1 = arith.constant 0 : i32
    return %c0_i32, %arg0, %c0_i32_0 : i32, i32, i32
  }
}

</mosaic_0001>

<bundles_post_ra>
// kernel: tpu_custom_call.1
= control target key start
LH: loop header
LB: loop body
LE: loop exit
PB: predicated region body
PF: predicated region fallthrough
CT: control target
= control target key end

     0   :  { %s1247_s0 = inlined_call_operand.vmem [shape: f32[24,32], index: 0, kind: input, shape index: {}]   ;;  %s1248_s1 = inlined_call_operand.vmem [shape: f32[3,24,8], index: 1, kind: input, shape index: {}]   ;;  %s1249_s2 = inlined_call_operand.vmem [shape: f32[8,24], index: 2, kind: input, shape index: {}]   ;;  %s1250_s3 = inlined_call_operand.vmem [shape: f32[24,24], index: 3, kind: input, shape index: {}]   ;;  %s1251_s4 = inlined_call_operand.vmem [shape: f32[32,24], index: 4, kind: input, shape index: {}]   ;;  %s1252_s5 = inlined_call_operand.vmem [shape: f32[24,64], index: 5, kind: input, shape index: {}]   ;;  %s1253_s6 = inlined_call_operand.vmem [shape: f32[24,64], index: 6, kind: input, shape index: {}]   ;;  %s1254_s7 = inlined_call_operand.vmem [shape: f32[64,24], index: 7, kind: input, shape index: {}]   ;;  %s1255_s8 = inlined_call_operand.vmem [shape: f32[1,24], index: 8, kind: input, shape index: {}]   ;;  %s1256_s9 = inlined_call_operand.hbm [shape: f32[24,64], index: 9, kind: output, shape index: {0}]   ;;  %s1257_s10 = inlined_call_operand.hbm [shape: f32[3,24,24], index: 10, kind: output, shape index: {1}]  }
   0x1   :  { %1259 = sst [smem:[#allocation9_spill]] %s1247_s0 }
   0x2   :  { %1260 = sst [smem:[#allocation10_spill]] %s1248_s1 }
   0x3   :  { %1261 = sst [smem:[#allocation11_spill]] %s1249_s2 }
   0x4   :  { %1262 = sst [smem:[#allocation12_spill]] %s1250_s3 }
   0x5   :  { %1263 = sst [smem:[#allocation13_spill]] %s1251_s4 }
   0x6   :  { %16 = vsyncpa [#allocation4], 0 }
   0x7   :  { %18 = vsyncpa [#allocation4 + $0x1], 0 }
   0x8   :  { %19 = vsyncpa [#allocation6], 0 }
   0x9   :  { %21 = vsyncpa [#allocation6 + $0x1], 0  ;;  %s1048_s13 = smov 0   ;;  %s1050_s14 = smov 0  }
   0xa   :  { %s1052_s15 = smov 0   ;;  %s1054_s16 = smov 0  }
   0xb LB: > { %s1069_s17 = sadd.s32 4294967295, %s988_s16   ;;  %s815_s18 = sadd.s32 4294967294, %s988_s16   ;;  %s988_s16 = sphi %s1054_s16, %s1275_s16   ;;  %s984_s15 = sphi %s1052_s15, %s1274_s15   ;;  %s980_s14 = sphi %s1050_s14, %s1273_s14   ;;  %s976_s13 = sphi %s1048_s13, %s1272_s13  }
   0xc   : > { %s1073_s19 = sadd.s32 1, %s988_s16   ;;  %s60_s20 = sadd.s32 1, %s984_s15 }
   0xd   : > { %s57_s21 = ssub.s32 %s988_s16, %s1073_s19  ;;  %p67_p0 = scmp.ne.s32.totalorder %s984_s15, %s980_s14 }
   0xe   : > { %p58_p1 = scmp.eq.s32.totalorder %s57_s21, 0  ;;  %p68_p2 = scmp.eq.s32.totalorder %s988_s16, 0 }
   0xf   : > { %p244_p3 = scmp.eq.s32.totalorder %s1069_s17, 2  ;;  %p249_p4 = scmp.ne.s32.totalorder %s980_s14, %s976_s13 }
  0x10   : > { %s1085_s22 = scalar_select %p58_p1, %s984_s15, %s60_s20  }
  0x11   : > { %p69_p5 = por %p68_p2, %p67_p0  ;;  %p1087_p6 = por %p244_p3, %p67_p0 }
  0x12   : > { %p250_p7 = scmp.eq.s32.totalorder %s815_s18, 2  ;;  %p817_p9 = scmp.ge.s32.totalorder %s988_s16, 3 }
  0x14   : > { %p1091_p8 = por %p250_p7, %p249_p4  ;;  %313 = sbr.rel (%p817_p9) target bundleno = 38 (0x26), region = 44 }
  0x19   : > { %323 = sbr.rel (!%p69_p5) target bundleno = 38 (0x26), region = 52  ;;  %s325_s25 = sand.u32 (%p69_p5), 1, %s984_s15  }
  0x1a   : > { %s818_s26 = sshll.u32 (%p69_p5), %s988_s16, 3  ;;  %s838_s27 = smul.u32 (%p69_p5), 24, %s325_s25 }
  0x1b   : > { %s1266_s1 = sld [smem:[#allocation10_spill]] (%p69_p5) }
  0x1c   : > { %s327_s11 = scalar_lea.vmem (%p69_p5), [#allocation2], %s838_s27 }
  0x21   : > { %s329_s30 = scalar_lea.vmem %s1266_s1, %s818_s26 }
  0x22   : > { %v362_v0 = vld [vmem:[%s329_s30] sm:$0xff]  ;;  %v364_v1 = vld [vmem:[%s329_s30 + $0x18] sm:$0xff]  ;;  %v366_v2 = vld [vmem:[%s329_s30 + $0x30] sm:$0xff] }
  0x23   : > { %363 = vst [vmem:[%s327_s11] sm:$0xff] %v362_v0 }
  0x24   : > { %365 = vst [vmem:[%s327_s11 + $0x8] sm:$0xff] %v364_v1 }
  0x25   : > { %367 = vst [vmem:[%s327_s11 + $0x10] sm:$0xff] %v366_v2 }
  0x26 PF: > { %p819_p10 = scmp.ge.s32.totalorder %s988_s16, 1  ;;  %p372_p11 = scmp.lt.s32.totalorder %s988_s16, 4 }
  0x28   : > { %p373_p12 = pnand %p819_p10, %p372_p11 }
  0x29   : > { %s1267_s2 = sld [smem:[#allocation11_spill]] (!%p373_p12)  ;;  %s1107_s20 = sand.u32 (!%p373_p12), 1, %s980_s14  }
  0x2a   : > { %376 = sbr.rel (%p373_p12) target bundleno = 516 (0x204), region = 90  ;;  %s1268_s4 = sld [smem:[#allocation13_spill]] (!%p373_p12) }
  0x2b   : > { %p425_p13 = scmp.lt.s32.totalorder (!%p373_p12), %s1069_s17, 2  ;;  %s1258_s28 = smul.u32 (!%p373_p12), 24, %s1107_s20 }
  0x2c   : > { %s1269_s3 = sld [smem:[#allocation12_spill]] (!%p373_p12)  ;;  %s820_s1 = sshll.u32 (!%p373_p12), %s1107_s20, 3 }
  0x2d   : > { %s381_s26 = scalar_lea.vmem (!%p373_p12), [#allocation2], %s1258_s28  ;;  %s1270_s0 = sld [smem:[#allocation9_spill]] (!%p373_p12) }
  0x2e   : > { %s834_s21 = sshll.u32 (!%p373_p12), %s1069_s17, 3 }
  0x2f   : > { %v433_v3 = vld [vmem:[%s1267_s2] sm:$0xff]  ;;  %vm434_vm0 = vcmask 64512   ;;  %s426_s18 = scalar_select %p425_p13, %s1069_s17, 2  ;;  %vm491_vm1 = vcmask 261120   ;;  %v432_v13 = vld [vmem:[%s381_s26 + $0x10] sm:$0xff]  ;;  %vm521_vm2 = vcmask 195584  }
  0x30   : > { %v490_v4 = vld [vmem:[%s1268_s4 + $0x18] sm:$0xff]  ;;  %v489_v5 = vld [vmem:[%s1268_s4 + $0x10] sm:$0xff]  ;;  %459 = vmatpush.msra.mxu0 %v433_v3  ;;  %v488_v7 = vld [vmem:[%s1268_s4 + $0x8] sm:$0xff]  ;;  %vm580_vm5 = vcmask 523264   ;;  %s914_s2 = scalar_lea.hbm %s1256_s9, 24 }
  0x31   : > { %507 = vmatpush.msra.mxu1 %v490_v4  ;;  %v430_v9 = vld [vmem:[%s381_s26] sm:$0xff]  ;;  %s821_s29 = sshll.u32 %s426_s18, 3  ;;  %v431_v12 = vld [vmem:[%s381_s26 + $0x8] sm:$0xff]  ;;  %v520_v15 = vld [vmem:[%s1253_s6 + $0x10] sm:$0xff]  ;;  %s417_s18 = scalar_lea.vmem [#allocation3], %s820_s1 }
  0x32   : > { %v625_v6 = vld [vmem:[%s1269_s3 + $0x10] sm:$0xff]  ;;  %v624_v8 = vld [vmem:[%s1269_s3 + $0x8] sm:$0xff]  ;;  %v487_v10 = vld [vmem:[%s1268_s4] sm:$0xff]  ;;  %822 = vmatmul.msk.f32.vlgmr.msra.gmra.mxu0 %vm434_vm0, %v430_v9  ;;  %538 = vmatpush.msra.mxu2 %v520_v15  ;;  %s686_s30 = sshll.u32 %s417_s18, 4  ;;  %s669_s26 = scalar_lea.sflag [#allocation4], %s1107_s20  ;;  %s687_s30 = int_to_ptr.vmem [resolvable:$true] %s686_s30 }
  0x33   : > { %648 = vmatpush.msra.mxu3 %v625_v6  ;;  %508 = vmatpush.msra.mxu1 %v489_v5  ;;  %s428_s12 = scalar_lea.vmem %s1270_s0, %s821_s29  ;;  %v623_v14 = vld [vmem:[%s1269_s3] sm:$0xff]  ;;  %v519_v16 = vld [vmem:[%s1253_s6 + $0x8] sm:$0xff]  ;;  %v517_v17 = vld [vmem:[%s1252_s5 + $0x10] sm:$0xff]  ;;  %s684_s29 = scalar_lea.hbm %s1256_s9, %s834_s21 }
  0x34   : > { %v429_v11 = vld [vmem:[%s428_s12] sm:$0xff]  ;;  %v516_v18 = vld [vmem:[%s1252_s5 + $0x8] sm:$0xff]  ;;  %539 = vmatpush.msra.mxu2 %v519_v16  ;;  %v575_v40 = vld [vmem:[%s1254_s7 + $0x38] sm:$0xff]  ;;  %s688_s11 = sshll.u32 %s684_s29, 4  ;;  %s689_s11 = int_to_ptr.hbm [resolvable:$true] %s688_s11 }
  0x35   : > { %649 = vmatpush.msra.mxu3 %v624_v8  ;;  %509 = vmatpush.msra.mxu1 %v488_v7  ;;  %v518_v19 = vld [vmem:[%s1253_s6] sm:$0xff]  ;;  %v574_v41 = vld [vmem:[%s1254_s7 + $0x30] sm:$0xff]  ;;  %v573_v42 = vld [vmem:[%s1254_s7 + $0x28] sm:$0xff]  ;;  %s908_s12 = sshra.s32 %s689_s11, 4  ;;  %s909_s12 = int_to_ptr.hbm [resolvable:$true] %s908_s12 }
  0x36   : > { %v515_v20 = vld [vmem:[%s1252_s5] sm:$0xff]  ;;  %540 = vmatpush.msra.mxu2 %v518_v19  ;;  %v571_v44 = vld [vmem:[%s1254_s7 + $0x18] sm:$0xff]  ;;  %v570_v45 = vld [vmem:[%s1254_s7 + $0x10] sm:$0xff]  ;;  %s910_s28 = scalar_lea.hbm %s909_s12, 8  ;;  %p915_p3 = scmp.lt.s32.totalorder %s909_s12, %s1256_s9 }
  0x37   : > { %510 = vmatpush.msra.mxu1 %v487_v10  ;;  %650 = vmatpush.msra.mxu3 %v623_v14  ;;  %v572_v43 = vld [vmem:[%s1254_s7 + $0x20] sm:$0xff]  ;;  %v569_v46 = vld [vmem:[%s1254_s7 + $0x8] sm:$0xff]  ;;  %p911_p0 = scmp.ne.s32.totalorder %s909_s12, %s910_s28  ;;  %p916_p4 = scmp.lt.s32.totalorder %s914_s2, %s910_s28 }
  0x38   : > { %825 = vmatmul.msk.f32.vlgmr.msra.gmra.mxu1 %vm491_vm1, %v429_v11  ;;  %592 = vmatpush.msrb.mxu2 %v575_v40  ;;  %v568_v47 = vld [vmem:[%s1254_s7] sm:$0xff] }
  0x39   : > { %561 = vmatpush.msrb.mxu1 %v517_v17  ;;  %p912_p1 = pnand %p911_p0, %p1087_p6  ;;  %p917_p5 = por %p916_p4, %p915_p3 }
  0x3a   : > { %823 = vmatmul.msk.f32.gmra.mxu0 %vm434_vm0, %v431_v12  ;;  %593 = vmatpush.msrb.mxu2 %v574_v41 }
  0x3b   : > { %562 = vmatpush.msrb.mxu1 %v516_v18  ;;  %p913_p2 = pneg %p912_p1 }
  0x3c   : > { %594 = vmatpush.msrb.mxu2 %v573_v42 }
  0x3d   : > { %563 = vmatpush.msrb.mxu1 %v515_v20  ;;  %p918_p7 = pnand %p917_p5, %p913_p2 }
  0x3e   : > { %595 = vmatpush.msrb.mxu2 %v572_v43 }
  0x40   : > { %596 = vmatpush.msrb.mxu2 %v571_v44 }
  0x42   : > { %824 = vmatmul.msk.f32.gmra.mxu0 %vm434_vm0, %v432_v13  ;;  %597 = vmatpush.msrb.mxu2 %v570_v45 }
  0x44   : > { %598 = vmatpush.msrb.mxu2 %v569_v46 }
  0x46   : > { %599 = vmatpush.msrb.mxu2 %v568_v47 }
  0xaf   : > { %v461_v21 = vpop.f32.mrf.mxu0 }
  0xb0   : > { %830 = vmatmul.msk.f32.vlgmr.msra.gmra.mxu3 %vm521_vm2, %v461_v21  ;;  %v470_v25 = vmul.f32 %v461_v21, %v461_v21 }
  0xb5   : > { %v512_v22 = vpop.f32.mrf.mxu1 }
  0xb6   : > { %826 = vmatmul.msk.f32.vlgmr.msra.gmra.mxu2 %vm521_vm2, %v512_v22 }
  0xb7   : > { %v464_v23 = vpop.f32.mrf.mxu0 }
  0xb8   : > { %831 = vmatmul.msk.f32.gmra.mxu3 %vm521_vm2, %v464_v23  ;;  %v471_v24 = vmul.f32 %v464_v23, %v464_v23 }
  0xba   : > { %v472_v27 = vadd.f32 %v471_v24, %v470_v25 }
  0xbf   : > { %v467_v26 = vpop.f32.mrf.mxu0 }
  0xc0   : > { %v473_v28 = vmul.f32 %v467_v26, %v467_v26  ;;  %832 = vmatmul.msk.f32.gmra.mxu3 %vm521_vm2, %v467_v26 }
  0xc2   : > { %v474_v29 = vadd.f32 %v473_v28, %v472_v27 }
  0xc4   : > { %888 = vrsqrt.f32 %v474_v29  ;;  %vm482_vm3 = vcmp.eq.f32.partialorder %v474_v29, inf  ;;  %v485_v37 = vand.u32 2147483648, %v474_v29  ;;  %vm484_vm4 = vcmp.eq.f32.partialorder %v474_v29, 0.0 }
  0xca   : > { %v889_v30 = vpop.eup %888 }
  0xcb   : > { %v476_v31 = vmul.f32 %v889_v30, %v474_v29 }
  0xcd   : > { %v477_v32 = vmul.f32 %v889_v30, %v476_v31 }
  0xcf   : > { %v478_v33 = vmul.f32 0.5, %v477_v32 }
  0xd1   : > { %v479_v34 = vsub.f32 1.5, %v478_v33 }
  0xd3   : > { %v480_v35 = vmul.f32 %v889_v30, %v479_v34 }
  0xd5   : > { %v481_v36 = vmul.f32 %v480_v35, %v474_v29 }
  0xd7   : > { %v483_v38 = vsel %vm482_vm3, %v474_v29, %v481_v36 }
  0xd8   : > { %v486_v39 = vsel %vm484_vm4, %v485_v37, %v483_v38 }
  0xd9   : > { %827 = vmatmul.msk.f32.vlgmr.msrb.gmra.mxu1 %vm521_vm2, %v486_v39 }
 0x139   : > { %v542_v48 = vpop.f32.mrf.mxu2 }
 0x156   : > { %v565_v49 = vpop.f32.mrf.mxu1 }
 0x157   : > { %v566_v50 = vadd.f32 %v565_v49, %v542_v48 }
 0x159   : > { %828 = vmatmul.msk.f32.vlgmr.msrb.gmra.mxu2 %vm580_vm5, %v566_v50  ;;  %661 = vst.msk [vmem:[%s417_s18] sm:$0xff] %vm580_vm5, %v566_v50 }
 0x15a   : > { %921 = shalt.err (!%p918_p7)
}
 0x15b   : > { %840 = dma.vmem_to_hbm [thread:$0]  (%p1087_p6), %s687_s30, 128, %s689_s11, %s669_s26   ;;  %v887_v51 = vld [vmem:[%s1255_s8] ss:$0 sm:$0xff]  ;;  %v652_v55 = vpop.f32.mrf.mxu3 }
 0x15c   : > { %s698_s3 = scalar_lea.hbm %s1257_s10, %s834_s21  ;;  %s1271_s4 = smul.u32 24, %s1107_s20 }
 0x15d   : > { %s701_s29 = sshll.u32 %s698_s3, 4  ;;  %s674_s17 = scalar_lea.sflag [#allocation6], %s1107_s20  ;;  %s702_s29 = int_to_ptr.hbm [resolvable:$true] %s701_s29 }
 0x15e   : > { %s424_s28 = scalar_lea.vmem [#allocation5], %s1271_s4  ;;  %s936_s21 = sshra.s32 %s702_s29, 4  ;;  %s937_s21 = int_to_ptr.hbm [resolvable:$true] %s936_s21 }
 0x15f   : > { %s699_s27 = sshll.u32 %s424_s28, 4  ;;  %s938_s30 = scalar_lea.hbm %s937_s21, 24  ;;  %s700_s27 = int_to_ptr.vmem [resolvable:$true] %s699_s27 }
 0x160   : > { %p939_p9 = scmp.ne.s32.totalorder %s937_s21, %s938_s30  ;;  %s942_s12 = scalar_lea.hbm %s1257_s10, 72 }
 0x161   : > { %p943_p12 = scmp.lt.s32.totalorder %s937_s21, %s1257_s10  ;;  %p944_p13 = scmp.lt.s32.totalorder %s942_s12, %s938_s30 }
 0x162   : > { %p940_p10 = pnand %p939_p9, %p1087_p6 }
 0x163   : > { %v655_v59 = vpop.f32.mrf.mxu3  ;;  %p945_p0 = por %p944_p13, %p943_p12 }
 0x164   : > { %p941_p11 = pneg %p940_p10 }
 0x166   : > { %p946_p1 = pnand %p945_p0, %p941_p11 }
 0x16b   : > { %v658_v4 = vpop.f32.mrf.mxu3 }
 0x1dc   : > { %v601_v52 = vpop.f32.mrf.mxu2 }
 0x1dd   : > { %v602_v53 = vadd.f32 %v887_v51, %v601_v52 }
 0x1df   : > { %v829_v54 = vmul.f32 -1.442695, %v602_v53 }
 0x1e1   : > { %890 = vpow2.f32 %v829_v54 }
 0x1e7   : > { %v891_v56 = vpop.eup %890 }
 0x1e8   : > { %v607_v57 = vadd.f32 1.0, %v891_v56 }
 0x1ea   : > { %892 = vrcp.f32 %v607_v57  ;;  %v619_v62 = vand.u32 2147483648, %v607_v57  ;;  %v617_v0 = vand.u32 2147483647, %v607_v57  ;;  %vm613_vm7 = vweird.f32 %v607_v57 }
 0x1ec   : > { %v620_v2 = vor.u32 1.1754944e-38, %v619_v62  ;;  %vm618_vm9 = vcmp.eq.f32.partialorder %v617_v0, 8.507059e+37 }
 0x1f0   : > { %v893_v58 = vpop.eup %892 }
 0x1f1   : > { %v609_v60 = vmul.f32 %v893_v58, %v607_v57  ;;  %vm614_vm6 = vweird.f32 %v893_v58 }
 0x1f2   : > { %vm615_vm8 = vmor %vm613_vm7, %vm614_vm6 }
 0x1f3   : > { %v610_v61 = vsub.f32 1.0, %v609_v60 }
 0x1f5   : > { %v611_v63 = vmul.f32 %v893_v58, %v610_v61 }
 0x1f7   : > { %v612_v1 = vadd.f32 %v893_v58, %v611_v63 }
 0x1f9   : > { %v616_v3 = vsel %vm615_vm8, %v893_v58, %v612_v1 }
 0x1fa   : > { %v621_v5 = vsel %vm618_vm9, %v620_v2, %v616_v3 }
 0x1fb   : > { %v662_v6 = vmul.f32 %v652_v55, %v621_v5  ;;  %v663_v7 = vmul.f32 %v655_v59, %v621_v5  ;;  %v664_v8 = vmul.f32 %v658_v4, %v621_v5 }
 0x1fd   : > { %665 = vst.msk [vmem:[%s424_s28] sm:$0xff] %vm521_vm2, %v662_v6 }
 0x1fe   : > { %666 = vst.msk [vmem:[%s424_s28 + $0x8] sm:$0xff] %vm521_vm2, %v663_v7 }
 0x1ff   : > { %667 = vst.msk [vmem:[%s424_s28 + $0x10] sm:$0xff] %vm521_vm2, %v664_v8 }
 0x200   : > { %949 = shalt.err (!%p946_p1)
}
 0x201   : > { %s990_s20 = smov 128   ;;  %s991_s25 = smov 384  }
 0x202   : > { %s992_s0 = smov 8  }
 0x203   : > { %841 = dma.vmem_to_hbm [thread:$0]  (%p1087_p6), %s700_s27, 384, %s702_s29, %s674_s17, %s990_s20, %s991_s25, %s992_s0  }
 0x204 PF: > { %p851_p2 = scmp.ge.s32.totalorder %s988_s16, 2  ;;  %s716_s2 = sand.u32 1, %s976_s13  }
 0x205   : > { %s717_s3 = scalar_lea.sflag [#allocation4], %s716_s2 }
 0x206   : > { %p845_p3 = pnand %p851_p2, %p1091_p8 }
 0x208   : > { %p846_p4 = pneg %p845_p3 }
 0x20a   : > { %967 = dma.done.wait (%p846_p4), %s717_s3, 128  }
 0x20b   : > { %969 = vsyncadd (%p846_p4), %s717_s3, 4294967168  ;;  %s727_s4 = scalar_lea.sflag [#allocation6], %s716_s2 }
 0x20c   : > { %971 = dma.done.wait (%p846_p4), %s727_s4, 384  }
 0x20d   : > { %973 = vsyncadd (%p846_p4), %s727_s4, 4294966912  ;;  %p24_p6 = scmp.ge.s32.totalorder %s1073_s19, 5   ;;  %s1272_s13 = smov %s980_s14 }
 0x20e   : > { %s1273_s14 = smov %s984_s15  ;;  %s1274_s15 = smov %s1085_s22 }
 0x20f   : > { %s1275_s16 = smov %s1073_s19  ;;  %26 = sbr.rel (!%p24_p6) target bundleno = 11 (0xb), region = 154 }
 0x214   :  { %733 = vsyncpa [#allocation4], 1 }
 0x215   :  { %735 = vsyncpa [#allocation4 + $0x1], 1 }
 0x216   :  { %736 = vsyncpa [#allocation6], 1 }
 0x217   :  { %738 = vsyncpa [#allocation6 + $0x1], 1 }

</bundles_post_ra>
